<compile_context>
chip_gen: v5e
topology: v5e:2x2
jax: 0.10.0
libtpu: 0.0.40
codegen_flags: <defaults>
</compile_context>

<pallas_src>
import functools
import math

import jax
import jax.numpy as jnp
from jax import lax
from jax.experimental import pallas as pl
from jax.experimental.pallas import tpu as pltpu

# ---- model hyper-params (small shapes consistent with the module) ----------
Z_SIZE = (4, 16, 16)      # (c, h, w)
Y_CLASSES = 10
Y_WEIGHT = 0.01
LOG_SCALE = 3.0

_C, _H, _W = Z_SIZE
_HW = _H * _W
_CHW = _C * _HW
_LOG_2PI = math.log(2.0 * math.pi)
_LOG_256 = math.log(256.0)
_INV_LOG_2 = 1.0 / math.log(2.0)
_MAX_TB = 512             # rows per batch tile (multiple of 8): ~2 MiB f32 / block


# ---------------------------------------------------------------------------
# FlowModel.forward : flow_list is empty -> identity + zero logdet.
# No Pallas kernel: a copy kernel would only burn HBM bandwidth; z aliases x.
# ---------------------------------------------------------------------------
def flow_forward(x):
    return x, jnp.zeros((x.shape[0],), jnp.float32)


# ---------------------------------------------------------------------------
# Fused loss kernel: per batch-tile partial sums of the entire loss_func hot path.
# ---------------------------------------------------------------------------
def _fused_loss_kernel(z_ref, y_ref, ones_ref, pw_ref, pb_ref, qw_ref, qb_ref,
                       o_ref, *, b_total, tb, c, hw, y_classes):
    blk = pl.program_id(0)

    z = z_ref[...].astype(jnp.float32)           # (tb, c*hw) lane-dense slab
    yv = y_ref[...]                              # (tb, 1) int32 labels

    # row validity mask for the ragged last block (mask BEFORE any cross-row sum)
    row_ids = blk * tb + lax.broadcasted_iota(jnp.int32, (tb, 1), 0)
    valid = row_ids < b_total                    # (tb, 1)

    # ---- one-hot(y), built in-kernel ---------------------------------------
    class_iota = lax.broadcasted_iota(jnp.int32, (tb, y_classes), 1)
    onehot = (class_iota == yv).astype(jnp.float32)                 # (tb, yc)

    # ---- y_prior LinearZeros on the MXU (exp(3*logs) pre-folded into W, b) --
    h = jnp.dot(onehot, pw_ref[...],
                preferred_element_type=jnp.float32) + pb_ref[...]   # (tb, 2c)
    mu = h[:, :c]                                # (tb, c)
    lv = h[:, c:]                                # (tb, c)

    # branchless numerically-stable softplus; exact reciprocal (precision note)
    var = jnp.maximum(lv, 0.0) + jnp.log1p(jnp.exp(-jnp.abs(lv)))   # (tb, c)
    inv_var = 1.0 / var
    log_var = jnp.log(var)

    # ---- per-channel Σz, Σz² via the MXU (block-diagonal ones matrix) -------
    ones_b = ones_ref[...]                       # (c*hw, c)
    s1 = jnp.dot(z, ones_b, preferred_element_type=jnp.float32)     # (tb, c)
    s2 = jnp.dot(z * z, ones_b, preferred_element_type=jnp.float32)  # (tb, c)
    zmean = s1 * (1.0 / float(hw))               # (tb, c)  == z.mean(dim=[2,3])

    # nll_normal summed over (c,h,w): 0.5 * Σ_c [hw*(log2π + log var) + Σ(z-mu)²/var]
    quad = s2 - 2.0 * mu * s1 + float(hw) * mu * mu                 # (tb, c)
    log_prob = 0.5 * jnp.sum(float(hw) * (_LOG_2PI + log_var) + quad * inv_var,
                             axis=1, keepdims=True)                 # (tb, 1)

    # empty flow_list -> logdet = 0 -> -logdet = 0
    nll = (log_prob * (1.0 / float(c * hw)) + _LOG_256) * _INV_LOG_2  # (tb, 1)

    # ---- y_projector LinearZeros on the MXU + BCEWithLogits (element sums) --
    logits = jnp.dot(zmean, qw_ref[...],
                     preferred_element_type=jnp.float32) + qb_ref[...]  # (tb, yc)
    bce_el = (jnp.maximum(logits, 0.0) - logits * onehot
              + jnp.log1p(jnp.exp(-jnp.abs(logits))))               # (tb, yc)
    bce_row = jnp.sum(bce_el, axis=1, keepdims=True)                # (tb, 1)

    # ---- masked per-block partial sums --------------------------------------
    nll_sum = jnp.sum(jnp.where(valid, nll, 0.0), axis=0, keepdims=True)      # (1,1)
    logprob_sum = jnp.sum(jnp.where(valid, log_prob, 0.0), axis=0, keepdims=True)
    bce_sum = jnp.sum(jnp.where(valid, bce_row, 0.0), axis=0, keepdims=True)

    # ---- one unmasked lane-dense (8,128) store: row 0 lanes [0..3] ----------
    lane = lax.broadcasted_iota(jnp.int32, (1, 128), 1)
    vals = jnp.where(lane == 0, nll_sum, 0.0)
    vals = jnp.where(lane == 1, logprob_sum, vals)
    # lane 2: partial sum of -logdet stays 0.0 (empty flow_list)
    vals = jnp.where(lane == 3, bce_sum, vals)
    sub = lax.broadcasted_iota(jnp.int32, (8, 128), 0)
    o_ref[...] = jnp.where(sub == 0, jnp.broadcast_to(vals, (8, 128)), 0.0)


def _batch_tile(b):
    # Whole batch in one block when small (block == full array dims is exempt from
    # the (8,128) divisibility rule); 512-row tiles (~2 MiB f32, double-buffered)
    # for pipelined DMA otherwise.
    return b if b <= _MAX_TB else _MAX_TB


def fused_loss_partials(z2d, y_col, ones_b, pw_t, pb, qw_t, qb):
    b = z2d.shape[0]
    tb = _batch_tile(b)
    nblk = pl.cdiv(b, tb)
    kernel = functools.partial(_fused_loss_kernel, b_total=b, tb=tb, c=_C,
                               hw=_HW, y_classes=Y_CLASSES)
    const = lambda i: (0, 0)
    flops = int(b * (4 * _CHW + 4 * _C * Y_CLASSES + 16 * _C + 8 * Y_CLASSES))
    transcendentals = int(b * (2 * _C + Y_CLASSES))
    bytes_accessed = int(b * _CHW * z2d.dtype.itemsize + b * 4
                         + nblk * 8 * 128 * 4 + 4 * _CHW * _C)
    return pl.pallas_call(
        kernel,
        grid=(nblk,),
        in_specs=[
            pl.BlockSpec((tb, _CHW), lambda i: (i, 0)),          # z slab
            pl.BlockSpec((tb, 1), lambda i: (i, 0)),             # labels
            pl.BlockSpec((_CHW, _C), const),                     # ones matrix
            pl.BlockSpec((Y_CLASSES, 2 * _C), const),            # y_prior Wᵀ·scale
            pl.BlockSpec((1, 2 * _C), const),                    # y_prior b·scale
            pl.BlockSpec((_C, Y_CLASSES), const),                # y_projector Wᵀ·scale
            pl.BlockSpec((1, Y_CLASSES), const),                 # y_projector b·scale
        ],
        out_specs=pl.BlockSpec((8, 128), lambda i: (i, 0)),
        out_shape=jax.ShapeDtypeStruct((nblk * 8, 128), jnp.float32),
        compiler_params=pltpu.CompilerParams(
            dimension_semantics=("parallel",),
            vmem_limit_bytes=32 * 1024 * 1024,
        ),
        cost_estimate=pl.CostEstimate(
            flops=flops, transcendentals=transcendentals,
            bytes_accessed=bytes_accessed),
    )(z2d, y_col, ones_b, pw_t, pb, qw_t, qb)


# ---------------------------------------------------------------------------
# Parameter init (matches FlowModel.__init__: LinearZeros is all-zero) + folding
# ---------------------------------------------------------------------------
def init_params():
    return {
        # y_prior: LinearZeros(y_classes -> 2*c), torch weight layout (out, in)
        "prior_w": jnp.zeros((2 * _C, Y_CLASSES), jnp.float32),
        "prior_b": jnp.zeros((2 * _C,), jnp.float32),
        "prior_logs": jnp.zeros((2 * _C,), jnp.float32),
        # y_projector: LinearZeros(c -> y_classes)
        "proj_w": jnp.zeros((Y_CLASSES, _C), jnp.float32),
        "proj_b": jnp.zeros((Y_CLASSES,), jnp.float32),
        "proj_logs": jnp.zeros((Y_CLASSES,), jnp.float32),
        # registered buffer (unused when y is given)
        "buffer": jnp.zeros((1, *Z_SIZE), jnp.float32),
    }


def prepare_params(params):
    """Fold exp(logs * LOG_SCALE) into weights/biases once, pre-transpose to the
    (in, out) layout the in-kernel MXU matmuls consume, and build the constant
    block-diagonal ones matrix used for the per-channel reductions."""
    ps = jnp.exp(params["prior_logs"] * LOG_SCALE)       # (2c,)
    qs = jnp.exp(params["proj_logs"] * LOG_SCALE)        # (yc,)
    pw_t = (params["prior_w"] * ps[:, None]).T           # (yc, 2c)
    qw_t = (params["proj_w"] * qs[:, None]).T            # (c, yc)
    pb = (params["prior_b"] * ps).reshape(1, 2 * _C)
    qb = (params["proj_b"] * qs).reshape(1, Y_CLASSES)
    ridx = jnp.arange(_CHW)[:, None] // _HW
    cidx = jnp.arange(_C)[None, :]
    ones_b = (ridx == cidx).astype(jnp.float32)          # (c*hw, c) block-diag ones
    return {"pw_t": pw_t, "pb": pb, "qw_t": qw_t, "qb": qb, "ones_b": ones_b}


# ---------------------------------------------------------------------------
# FlowModel.loss_func — one fused Pallas kernel + a trivial finishing reduce.
# ---------------------------------------------------------------------------
def loss_func(prepared, x, y):
    b = x.shape[0]
    z, _logdet = flow_forward(x)                 # z = x, logdet = 0
    # Native dtype (no wrapper-side f32 copy); metadata-only reshape to a
    # lane-dense (b, c*h*w) slab.  The kernel upcasts once after load.
    z2d = z.reshape(b, _CHW)
    y_col = y.astype(jnp.int32).reshape(b, 1)

    partials = fused_loss_partials(z2d, y_col, prepared["ones_b"],
                                   prepared["pw_t"], prepared["pb"],
                                   prepared["qw_t"], prepared["qb"])
    totals = jnp.sum(partials, axis=0)           # (128,): [Σnll, Σlog_prob, Σ(-logdet), Σbce]

    inv_b = 1.0 / float(b)
    classification = (Y_WEIGHT / float(b * Y_CLASSES)) * totals[3]
    loss = totals[0] * inv_b + classification
    return {
        "loss": loss,
        "log_prob": totals[1] * inv_b,
        "logdet": totals[2] * inv_b,   # mean of -logdet; 0 for empty flow_list
        "classification": classification,
    }


# TODO(synk): FlowModel.sample/inverse/reconstruct need concrete FlowLayer
# subclasses (flow_list is empty in the base class), so there is nothing to invert.
# TODO(synk): this fused loss kernel is forward/eval only; training would need a
# custom_vjp (or plain-JAX math) since pallas_call is not auto-differentiable.
# Note: at tiny deployment batches (b <~ 64) launch overhead dominates and the
# plain-XLA loss is preferable; the kernel pays off once the z read is >~100s of KiB.

if __name__ == "__main__":
    key = jax.random.PRNGKey(0)
    b = 2
    x = jax.random.uniform(key, (b, *Z_SIZE), dtype=jnp.float32)
    y = jnp.array([1, 7], dtype=jnp.int32)

    params = init_params()
    prepared = prepare_params(params)

    # forward pass (the module's forward): z = x, logdet = 0
    z, logdet = flow_forward(x)

    # full loss computation: one fused Pallas kernel + tiny finishing reduce
    losses = loss_func(prepared, x, y)

    jax.block_until_ready((z, logdet, losses))
    print("KERNEL_OK")
</pallas_src>

<mosaic_0001>
module attributes {stable_mosaic.version = 11 : i64} {
  func.func @_fused_loss_kernel(%arg0: i32, %arg1: memref<2x1024xf32, #tpu.memory_space<vmem>>, %arg2: memref<2x1xi32, #tpu.memory_space<vmem>>, %arg3: memref<1024x4xf32, #tpu.memory_space<vmem>>, %arg4: memref<10x8xf32, #tpu.memory_space<vmem>>, %arg5: memref<1x8xf32, #tpu.memory_space<vmem>>, %arg6: memref<4x10xf32, #tpu.memory_space<vmem>>, %arg7: memref<1x10xf32, #tpu.memory_space<vmem>>, %arg8: memref<8x128xf32, #tpu.memory_space<vmem>>) attributes {dimension_semantics = [#tpu.dimension_semantics<parallel>], iteration_bounds = array<i64: 1>, scalar_prefetch = 0 : i64, scratch_operands = 0 : i64, tpu.core_type = #tpu.core_type<tc>, window_params = [{transform_indices = @transform_0, window_bounds = array<i64: 2, 1024>}, {transform_indices = @transform_1, window_bounds = array<i64: 2, 1>}, {pipeline_mode = #tpu.pipeline_mode<synchronous>, transform_indices = @transform_2, window_bounds = array<i64: 1024, 4>}, {pipeline_mode = #tpu.pipeline_mode<synchronous>, transform_indices = @transform_3, window_bounds = array<i64: 10, 8>}, {pipeline_mode = #tpu.pipeline_mode<synchronous>, transform_indices = @transform_4, window_bounds = array<i64: 1, 8>}, {pipeline_mode = #tpu.pipeline_mode<synchronous>, transform_indices = @transform_5, window_bounds = array<i64: 4, 10>}, {pipeline_mode = #tpu.pipeline_mode<synchronous>, transform_indices = @transform_6, window_bounds = array<i64: 1, 10>}, {transform_indices = @transform_7, window_bounds = array<i64: 8, 128>}]} {
    %c0 = arith.constant 0 : index
    %c0_0 = arith.constant 0 : index
    %0 = vector.load %arg1[%c0, %c0_0] : memref<2x1024xf32, #tpu.memory_space<vmem>>, vector<2x1024xf32>
    %c0_1 = arith.constant 0 : index
    %c0_2 = arith.constant 0 : index
    %1 = vector.load %arg2[%c0_1, %c0_2] : memref<2x1xi32, #tpu.memory_space<vmem>>, vector<2x1xi32>
    %c2_i32 = arith.constant 2 : i32
    %2 = arith.muli %arg0, %c2_i32 : i32
    %3 = tpu.iota {dimensions = array<i32: 0>} : vector<2x1xi32>
    %4 = vector.broadcast %2 : i32 to vector<2x1xi32>
    %5 = arith.addi %4, %3 : vector<2x1xi32>
    %c2_i32_3 = arith.constant 2 : i32
    %6 = vector.broadcast %c2_i32_3 : i32 to vector<2x1xi32>
    %7 = arith.cmpi slt, %5, %6 : vector<2x1xi32>
    %8 = tpu.iota {dimensions = array<i32: 1>} : vector<2x10xi32>
    %9 = vector.broadcast %1 : vector<2x1xi32> to vector<2x10xi32>
    %10 = arith.cmpi eq, %8, %9 : vector<2x10xi32>
    %11 = arith.extui %10 : vector<2x10xi1> to vector<2x10xi32>
    %12 = arith.sitofp %11 : vector<2x10xi32> to vector<2x10xf32>
    %c0_4 = arith.constant 0 : index
    %c0_5 = arith.constant 0 : index
    %13 = vector.load %arg4[%c0_4, %c0_5] : memref<10x8xf32, #tpu.memory_space<vmem>>, vector<10x8xf32>
    %cst = arith.constant dense<0.000000e+00> : vector<2x8xf32>
    %14 = tpu.matmul %12, %13, %cst {dimension_numbers = #tpu.dot_dimension_numbers<[1], [0], [0], [1], [0, 0, 1, 1], [], []>} : vector<2x10xf32>, vector<10x8xf32>, vector<2x8xf32> -> vector<2x8xf32>
    %c0_6 = arith.constant 0 : index
    %c0_7 = arith.constant 0 : index
    %15 = vector.load %arg5[%c0_6, %c0_7] : memref<1x8xf32, #tpu.memory_space<vmem>>, vector<1x8xf32>
    %16 = vector.broadcast %15 : vector<1x8xf32> to vector<2x8xf32>
    %17 = arith.addf %14, %16 : vector<2x8xf32>
    %18 = vector.extract_strided_slice %17 {offsets = [0, 0], sizes = [2, 4], strides = [1, 1]} : vector<2x8xf32> to vector<2x4xf32>
    %19 = vector.extract_strided_slice %17 {offsets = [0, 4], sizes = [2, 4], strides = [1, 1]} : vector<2x8xf32> to vector<2x4xf32>
    %cst_8 = arith.constant 0.000000e+00 : f32
    %20 = vector.broadcast %cst_8 : f32 to vector<2x4xf32>
    %21 = arith.maximumf %19, %20 : vector<2x4xf32>
    %22 = math.absf %19 : vector<2x4xf32>
    %cst_9 = arith.constant 0.000000e+00 : f32
    %23 = vector.broadcast %cst_9 : f32 to vector<2x4xf32>
    %24 = arith.subf %23, %22 : vector<2x4xf32>
    %25 = math.exp %24 : vector<2x4xf32>
    %26 = math.log1p %25 : vector<2x4xf32>
    %27 = arith.addf %21, %26 : vector<2x4xf32>
    %cst_10 = arith.constant 1.000000e+00 : f32
    %28 = vector.broadcast %cst_10 : f32 to vector<2x4xf32>
    %29 = arith.divf %28, %27 : vector<2x4xf32>
    %30 = math.log %27 : vector<2x4xf32>
    %c0_11 = arith.constant 0 : index
    %c0_12 = arith.constant 0 : index
    %31 = vector.load %arg3[%c0_11, %c0_12] : memref<1024x4xf32, #tpu.memory_space<vmem>>, vector<1024x4xf32>
    %cst_13 = arith.constant dense<0.000000e+00> : vector<2x4xf32>
    %32 = tpu.matmul %0, %31, %cst_13 {dimension_numbers = #tpu.dot_dimension_numbers<[1], [0], [0], [1], [0, 0, 1, 1], [], []>} : vector<2x1024xf32>, vector<1024x4xf32>, vector<2x4xf32> -> vector<2x4xf32>
    %33 = arith.mulf %0, %0 : vector<2x1024xf32>
    %cst_14 = arith.constant dense<0.000000e+00> : vector<2x4xf32>
    %34 = tpu.matmul %33, %31, %cst_14 {dimension_numbers = #tpu.dot_dimension_numbers<[1], [0], [0], [1], [0, 0, 1, 1], [], []>} : vector<2x1024xf32>, vector<1024x4xf32>, vector<2x4xf32> -> vector<2x4xf32>
    %cst_15 = arith.constant 3.906250e-03 : f32
    %35 = vector.broadcast %cst_15 : f32 to vector<2x4xf32>
    %36 = arith.mulf %32, %35 : vector<2x4xf32>
    %cst_16 = arith.constant 2.000000e+00 : f32
    %37 = vector.broadcast %cst_16 : f32 to vector<2x4xf32>
    %38 = arith.mulf %37, %18 : vector<2x4xf32>
    %39 = arith.mulf %38, %32 : vector<2x4xf32>
    %40 = arith.subf %34, %39 : vector<2x4xf32>
    %cst_17 = arith.constant 2.560000e+02 : f32
    %41 = vector.broadcast %cst_17 : f32 to vector<2x4xf32>
    %42 = arith.mulf %41, %18 : vector<2x4xf32>
    %43 = arith.mulf %42, %18 : vector<2x4xf32>
    %44 = arith.addf %40, %43 : vector<2x4xf32>
    %cst_18 = arith.constant 1.83787704 : f32
    %45 = vector.broadcast %cst_18 : f32 to vector<2x4xf32>
    %46 = arith.addf %45, %30 : vector<2x4xf32>
    %cst_19 = arith.constant 2.560000e+02 : f32
    %47 = vector.broadcast %cst_19 : f32 to vector<2x4xf32>
    %48 = arith.mulf %47, %46 : vector<2x4xf32>
    %49 = arith.mulf %44, %29 : vector<2x4xf32>
    %50 = arith.addf %48, %49 : vector<2x4xf32>
    %cst_20 = arith.constant dense<0.000000e+00> : vector<2xf32>
    %51 = vector.multi_reduction <add>, %50, %cst_20 [1] : vector<2x4xf32> to vector<2xf32>
    %52 = vector.shape_cast %51 : vector<2xf32> to vector<2x1xf32>
    %cst_21 = arith.constant 5.000000e-01 : f32
    %53 = vector.broadcast %cst_21 : f32 to vector<2x1xf32>
    %54 = arith.mulf %53, %52 : vector<2x1xf32>
    %cst_22 = arith.constant 9.765625E-4 : f32
    %55 = vector.broadcast %cst_22 : f32 to vector<2x1xf32>
    %56 = arith.mulf %54, %55 : vector<2x1xf32>
    %cst_23 = arith.constant 5.54517746 : f32
    %57 = vector.broadcast %cst_23 : f32 to vector<2x1xf32>
    %58 = arith.addf %56, %57 : vector<2x1xf32>
    %cst_24 = arith.constant 1.44269502 : f32
    %59 = vector.broadcast %cst_24 : f32 to vector<2x1xf32>
    %60 = arith.mulf %58, %59 : vector<2x1xf32>
    %c0_25 = arith.constant 0 : index
    %c0_26 = arith.constant 0 : index
    %61 = vector.load %arg6[%c0_25, %c0_26] : memref<4x10xf32, #tpu.memory_space<vmem>>, vector<4x10xf32>
    %cst_27 = arith.constant dense<0.000000e+00> : vector<2x10xf32>
    %62 = tpu.matmul %36, %61, %cst_27 {dimension_numbers = #tpu.dot_dimension_numbers<[1], [0], [0], [1], [0, 0, 1, 1], [], []>} : vector<2x4xf32>, vector<4x10xf32>, vector<2x10xf32> -> vector<2x10xf32>
    %c0_28 = arith.constant 0 : index
    %c0_29 = arith.constant 0 : index
    %63 = vector.load %arg7[%c0_28, %c0_29] : memref<1x10xf32, #tpu.memory_space<vmem>>, vector<1x10xf32>
    %64 = vector.broadcast %63 : vector<1x10xf32> to vector<2x10xf32>
    %65 = arith.addf %62, %64 : vector<2x10xf32>
    %cst_30 = arith.constant 0.000000e+00 : f32
    %66 = vector.broadcast %cst_30 : f32 to vector<2x10xf32>
    %67 = arith.maximumf %65, %66 : vector<2x10xf32>
    %68 = arith.mulf %65, %12 : vector<2x10xf32>
    %69 = arith.subf %67, %68 : vector<2x10xf32>
    %70 = math.absf %65 : vector<2x10xf32>
    %cst_31 = arith.constant 0.000000e+00 : f32
    %71 = vector.broadcast %cst_31 : f32 to vector<2x10xf32>
    %72 = arith.subf %71, %70 : vector<2x10xf32>
    %73 = math.exp %72 : vector<2x10xf32>
    %74 = math.log1p %73 : vector<2x10xf32>
    %75 = arith.addf %69, %74 : vector<2x10xf32>
    %cst_32 = arith.constant dense<0.000000e+00> : vector<2xf32>
    %76 = vector.multi_reduction <add>, %75, %cst_32 [1] : vector<2x10xf32> to vector<2xf32>
    %77 = vector.shape_cast %76 : vector<2xf32> to vector<2x1xf32>
    %cst_33 = arith.constant 0.000000e+00 : f32
    %78 = vector.broadcast %cst_33 : f32 to vector<2x1xf32>
    %79 = arith.select %7, %60, %78 : vector<2x1xi1>, vector<2x1xf32>
    %cst_34 = arith.constant dense<0.000000e+00> : vector<1xf32>
    %80 = vector.multi_reduction <add>, %79, %cst_34 [0] : vector<2x1xf32> to vector<1xf32>
    %81 = vector.shape_cast %80 : vector<1xf32> to vector<1x1xf32>
    %cst_35 = arith.constant 0.000000e+00 : f32
    %82 = vector.broadcast %cst_35 : f32 to vector<2x1xf32>
    %83 = arith.select %7, %54, %82 : vector<2x1xi1>, vector<2x1xf32>
    %cst_36 = arith.constant dense<0.000000e+00> : vector<1xf32>
    %84 = vector.multi_reduction <add>, %83, %cst_36 [0] : vector<2x1xf32> to vector<1xf32>
    %85 = vector.shape_cast %84 : vector<1xf32> to vector<1x1xf32>
    %cst_37 = arith.constant 0.000000e+00 : f32
    %86 = vector.broadcast %cst_37 : f32 to vector<2x1xf32>
    %87 = arith.select %7, %77, %86 : vector<2x1xi1>, vector<2x1xf32>
    %cst_38 = arith.constant dense<0.000000e+00> : vector<1xf32>
    %88 = vector.multi_reduction <add>, %87, %cst_38 [0] : vector<2x1xf32> to vector<1xf32>
    %89 = vector.shape_cast %88 : vector<1xf32> to vector<1x1xf32>
    %90 = tpu.iota {dimensions = array<i32: 1>} : vector<1x128xi32>
    %c0_i32 = arith.constant 0 : i32
    %91 = vector.broadcast %c0_i32 : i32 to vector<1x128xi32>
    %92 = arith.cmpi eq, %90, %91 : vector<1x128xi32>
    %cst_39 = arith.constant 0.000000e+00 : f32
    %93 = vector.shape_cast %81 : vector<1x1xf32> to vector<1x1xf32>
    %94 = vector.broadcast %93 : vector<1x1xf32> to vector<1x128xf32>
    %95 = vector.broadcast %cst_39 : f32 to vector<1x128xf32>
    %96 = arith.select %92, %94, %95 : vector<1x128xi1>, vector<1x128xf32>
    %c1_i32 = arith.constant 1 : i32
    %97 = vector.broadcast %c1_i32 : i32 to vector<1x128xi32>
    %98 = arith.cmpi eq, %90, %97 : vector<1x128xi32>
    %99 = vector.shape_cast %85 : vector<1x1xf32> to vector<1x1xf32>
    %100 = vector.broadcast %99 : vector<1x1xf32> to vector<1x128xf32>
    %101 = arith.select %98, %100, %96 : vector<1x128xi1>, vector<1x128xf32>
    %c3_i32 = arith.constant 3 : i32
    %102 = vector.broadcast %c3_i32 : i32 to vector<1x128xi32>
    %103 = arith.cmpi eq, %90, %102 : vector<1x128xi32>
    %104 = vector.shape_cast %89 : vector<1x1xf32> to vector<1x1xf32>
    %105 = vector.broadcast %104 : vector<1x1xf32> to vector<1x128xf32>
    %106 = arith.select %103, %105, %101 : vector<1x128xi1>, vector<1x128xf32>
    %107 = tpu.iota {dimensions = array<i32: 0>} : vector<8x128xi32>
    %c0_i32_40 = arith.constant 0 : i32
    %108 = vector.broadcast %c0_i32_40 : i32 to vector<8x128xi32>
    %109 = arith.cmpi eq, %107, %108 : vector<8x128xi32>
    %110 = vector.shape_cast %106 : vector<1x128xf32> to vector<1x128xf32>
    %111 = vector.broadcast %110 : vector<1x128xf32> to vector<8x128xf32>
    %cst_41 = arith.constant 0.000000e+00 : f32
    %112 = vector.broadcast %cst_41 : f32 to vector<8x128xf32>
    %113 = arith.select %109, %111, %112 : vector<8x128xi1>, vector<8x128xf32>
    %c0_42 = arith.constant 0 : index
    %c0_43 = arith.constant 0 : index
    %114 = vector.load %arg8[%c0_42, %c0_43] : memref<8x128xf32, #tpu.memory_space<vmem>>, vector<8x128xf32>
    tpu.vector_store %arg8[%c0_42, %c0_43], %113 {strides = array<i32>} : memref<8x128xf32, #tpu.memory_space<vmem>>, vector<8x128xf32>,
    return
  }
  func.func @transform_0(%arg0: i32) -> (i32, i32) {
    %c0_i32 = arith.constant 0 : i32
    %c0_i32_0 = arith.constant 0 : i32
    return %arg0, %c0_i32 : i32, i32
  }
  func.func @transform_1(%arg0: i32) -> (i32, i32) {
    %c0_i32 = arith.constant 0 : i32
    %c0_i32_0 = arith.constant 0 : i32
    return %arg0, %c0_i32 : i32, i32
  }
  func.func @transform_2(%arg0: i32) -> (i32, i32) {
    %c0_i32 = arith.constant 0 : i32
    %c0_i32_0 = arith.constant 0 : i32
    %c0_i32_1 = arith.constant 0 : i32
    return %c0_i32, %c0_i32_0 : i32, i32
  }
  func.func @transform_3(%arg0: i32) -> (i32, i32) {
    %c0_i32 = arith.constant 0 : i32
    %c0_i32_0 = arith.constant 0 : i32
    %c0_i32_1 = arith.constant 0 : i32
    return %c0_i32, %c0_i32_0 : i32, i32
  }
  func.func @transform_4(%arg0: i32) -> (i32, i32) {
    %c0_i32 = arith.constant 0 : i32
    %c0_i32_0 = arith.constant 0 : i32
    %c0_i32_1 = arith.constant 0 : i32
    return %c0_i32, %c0_i32_0 : i32, i32
  }
  func.func @transform_5(%arg0: i32) -> (i32, i32) {
    %c0_i32 = arith.constant 0 : i32
    %c0_i32_0 = arith.constant 0 : i32
    %c0_i32_1 = arith.constant 0 : i32
    return %c0_i32, %c0_i32_0 : i32, i32
  }
  func.func @transform_6(%arg0: i32) -> (i32, i32) {
    %c0_i32 = arith.constant 0 : i32
    %c0_i32_0 = arith.constant 0 : i32
    %c0_i32_1 = arith.constant 0 : i32
    return %c0_i32, %c0_i32_0 : i32, i32
  }
  func.func @transform_7(%arg0: i32) -> (i32, i32) {
    %c0_i32 = arith.constant 0 : i32
    %c0_i32_0 = arith.constant 0 : i32
    return %arg0, %c0_i32 : i32, i32
  }
}

</mosaic_0001>

<bundles_post_ra>
// kernel: tpu_custom_call.1
= control target key start
LH: loop header
LB: loop body
LE: loop exit
PB: predicated region body
PF: predicated region fallthrough
CT: control target
= control target key end

     0   :  { %v787_v3 = vmov 0   ;;  %vm54_vm0 = vcmask 1041408   ;;  %s1783_s0 = inlined_call_operand.vmem [shape: f32[2,1024], index: 0, kind: input, shape index: {}]   ;;  %s1784_s1 = inlined_call_operand.vmem [shape: s32[2,1], index: 1, kind: input, shape index: {}]   ;;  %s1785_s2 = inlined_call_operand.vmem [shape: f32[1024,4], index: 2, kind: input, shape index: {}]   ;;  %s1786_s3 = inlined_call_operand.vmem [shape: f32[10,8], index: 3, kind: input, shape index: {}]   ;;  %s1787_s4 = inlined_call_operand.vmem [shape: f32[1,8], index: 4, kind: input, shape index: {}]   ;;  %s1788_s5 = inlined_call_operand.vmem [shape: f32[4,10], index: 5, kind: input, shape index: {}]   ;;  %s1789_s6 = inlined_call_operand.vmem [shape: f32[1,10], index: 6, kind: input, shape index: {}]   ;;  %s1790_s7 = inlined_call_operand.hbm [shape: f32[8,128], index: 7, kind: output, shape index: {}]  }
   0x1   :  { %v29_v0 = vld [vmem:[%s1784_s1] sm:$0x3]  ;;  %v838_v1 = vld [vmem:[%s1785_s2 + $0xf8] sm:$0xff]  ;;  %v843_v2 = vld [vmem:[%s1785_s2 + $0xf0] sm:$0xff]  ;;  %746 = vset.pattern.permute.xlu0 %v787_v3 }
   0x2   :  { %279 = vmatpush.msra.mxu2 %v838_v1  ;;  %v849_v4 = vld [vmem:[%s1785_s2 + $0x178] sm:$0xff]  ;;  %39 = vperm.xlu0 %746, %v29_v0   ;;  %v860_v6 = vld [vmem:[%s1785_s2 + $0xe8] sm:$0xff]  ;;  %v865_v7 = vld [vmem:[%s1785_s2 + $0x170] sm:$0xff] }
   0x3   :  { %v854_v5 = vld [vmem:[%s1785_s2 + $0x78] sm:$0xff]  ;;  %299 = vmatpush.msra.mxu3 %v849_v4  ;;  %v870_v8 = vld [vmem:[%s1785_s2 + $0x70] sm:$0xff]  ;;  %v877_v9 = vld [vmem:[%s1785_s2 + $0x168] sm:$0xff] }
   0x4   :  { %280 = vmatpush.msra.mxu2 %v843_v2  ;;  %259 = vmatpush.msra.mxu1 %v854_v5  ;;  %v45_v10 = vld [vmem:[%s1786_s3 + $0x8] sm:$0x3]  ;;  %v886_v11 = vld [vmem:[%s1785_s2 + $0xe0] sm:$0xff]  ;;  %v908_v15 = vld [vmem:[%s1785_s2 + $0xd8] sm:$0xff] }
   0x5   :  { %300 = vmatpush.msra.mxu3 %v865_v7  ;;  %737 = vmatpush.msk.msra.mxu0 %vm54_vm0, %v45_v10  ;;  %v892_v12 = vld [vmem:[%s1785_s2 + $0x68] sm:$0xff]  ;;  %v44_v13 = vld [vmem:[%s1786_s3] sm:$0xff]  ;;  %v918_v17 = vld [vmem:[%s1785_s2 + $0x1f8] sm:$0xff] }
   0x6   :  { %281 = vmatpush.msra.mxu2 %v860_v6  ;;  %260 = vmatpush.msra.mxu1 %v870_v8  ;;  %v902_v14 = vld [vmem:[%s1785_s2 + $0x160] sm:$0xff]  ;;  %1848 = vst [vmem:[#allocation5_spill] sm:$0xff] %v918_v17  ;;  %v925_v18 = vld [vmem:[%s1785_s2 + $0x158] sm:$0xff]  ;;  %v930_v19 = vld [vmem:[%s1785_s2 + $0x1f0] sm:$0xff] }
   0x7   :  { %301 = vmatpush.msra.mxu3 %v877_v9  ;;  %73 = vmatpush.msra.mxu0 %v44_v13  ;;  %v913_v16 = vld [vmem:[%s1785_s2 + $0x60] sm:$0xff]  ;;  %1849 = vst [vmem:[#allocation6_spill] sm:$0xff] %v930_v19  ;;  %v936_v20 = vld [vmem:[%s1785_s2 + $0xd0] sm:$0xff]  ;;  %v942_v21 = vld [vmem:[%s1785_s2 + $0x58] sm:$0xff] }
   0x8   :  { %282 = vmatpush.msra.mxu2 %v886_v11  ;;  %261 = vmatpush.msra.mxu1 %v892_v12  ;;  %v949_v22 = vld [vmem:[%s1785_s2 + $0x150] sm:$0xff]  ;;  %v954_v23 = vld [vmem:[%s1785_s2 + $0x1e8] sm:$0xff]  ;;  %v978_v27 = vld [vmem:[%s1785_s2 + $0x1e0] sm:$0xff] }
   0x9   :  { %302 = vmatpush.msra.mxu3 %v902_v14  ;;  %319 = vmatpush.msrb.mxu0 %v918_v17  ;;  %1850 = vst [vmem:[#allocation7_spill] sm:$0xff] %v954_v23  ;;  %v960_v24 = vld [vmem:[%s1785_s2 + $0xc8] sm:$0xff]  ;;  %v966_v25 = vld [vmem:[%s1785_s2 + $0x50] sm:$0xff]  ;;  %v984_v28 = vld [vmem:[%s1785_s2 + $0xc0] sm:$0xff] }
   0xa   :  { %283 = vmatpush.msra.mxu2 %v908_v15  ;;  %262 = vmatpush.msra.mxu1 %v913_v16  ;;  %v973_v26 = vld [vmem:[%s1785_s2 + $0x148] sm:$0xff]  ;;  %1851 = vst [vmem:[#allocation8_spill] sm:$0xff] %v978_v27  ;;  %v997_v30 = vld [vmem:[%s1785_s2 + $0x140] sm:$0xff]  ;;  %v1002_v31 = vld [vmem:[%s1785_s2 + $0x1d8] sm:$0xff] }
   0xb   :  { %303 = vmatpush.msra.mxu3 %v925_v18  ;;  %320 = vmatpush.msrb.mxu0 %v930_v19  ;;  %v990_v29 = vld [vmem:[%s1785_s2 + $0x48] sm:$0xff]  ;;  %1852 = vst [vmem:[#allocation9_spill] sm:$0xff] %v1002_v31  ;;  %v1008_v32 = vld [vmem:[%s1785_s2 + $0xb8] sm:$0xff]  ;;  %v1014_v33 = vld [vmem:[%s1785_s2 + $0x40] sm:$0xff] }
   0xc   :  { %284 = vmatpush.msra.mxu2 %v936_v20  ;;  %263 = vmatpush.msra.mxu1 %v942_v21  ;;  %v1021_v34 = vld [vmem:[%s1785_s2 + $0x138] sm:$0xff]  ;;  %v1026_v35 = vld [vmem:[%s1785_s2 + $0x1d0] sm:$0xff]  ;;  %v1050_v39 = vld [vmem:[%s1785_s2 + $0x1c8] sm:$0xff] }
   0xd   :  { %304 = vmatpush.msra.mxu3 %v949_v22  ;;  %321 = vmatpush.msrb.mxu0 %v954_v23  ;;  %1853 = vst [vmem:[#allocation10_spill] sm:$0xff] %v1026_v35  ;;  %v1032_v36 = vld [vmem:[%s1785_s2 + $0xb0] sm:$0xff]  ;;  %v1038_v37 = vld [vmem:[%s1785_s2 + $0x38] sm:$0xff]  ;;  %v1056_v40 = vld [vmem:[%s1785_s2 + $0xa8] sm:$0xff] }
   0xe   :  { %285 = vmatpush.msra.mxu2 %v960_v24  ;;  %264 = vmatpush.msra.mxu1 %v966_v25  ;;  %v1045_v38 = vld [vmem:[%s1785_s2 + $0x130] sm:$0xff]  ;;  %1854 = vst [vmem:[#allocation11_spill] sm:$0xff] %v1050_v39  ;;  %v1069_v42 = vld [vmem:[%s1785_s2 + $0x128] sm:$0xff]  ;;  %v1074_v43 = vld [vmem:[%s1785_s2 + $0x1c0] sm:$0xff] }
   0xf   :  { %305 = vmatpush.msra.mxu3 %v973_v26  ;;  %322 = vmatpush.msrb.mxu0 %v978_v27  ;;  %v1062_v41 = vld [vmem:[%s1785_s2 + $0x30] sm:$0xff]  ;;  %1855 = vst [vmem:[#allocation12_spill] sm:$0xff] %v1074_v43  ;;  %v1080_v44 = vld [vmem:[%s1785_s2 + $0xa0] sm:$0xff]  ;;  %v1086_v45 = vld [vmem:[%s1785_s2 + $0x28] sm:$0xff] }
  0x10   :  { %286 = vmatpush.msra.mxu2 %v984_v28  ;;  %265 = vmatpush.msra.mxu1 %v990_v29  ;;  %v1093_v46 = vld [vmem:[%s1785_s2 + $0x120] sm:$0xff]  ;;  %v1098_v47 = vld [vmem:[%s1785_s2 + $0x1b8] sm:$0xff]  ;;  %v1117_v50 = vld [vmem:[%s1785_s2 + $0x90] sm:$0xff] }
  0x11   :  { %306 = vmatpush.msra.mxu3 %v997_v30  ;;  %323 = vmatpush.msrb.mxu0 %v1002_v31  ;;  %1856 = vst [vmem:[#allocation13_spill] sm:$0xff] %v1098_v47  ;;  %v1104_v48 = vld [vmem:[%s1785_s2 + $0x98] sm:$0xff]  ;;  %v1110_v49 = vld [vmem:[%s1785_s2 + $0x20] sm:$0xff]  ;;  %v1127_v52 = vld [vmem:[%s1785_s2 + $0x1b0] sm:$0xff] }
  0x12   :  { %287 = vmatpush.msra.mxu2 %v1008_v32  ;;  %266 = vmatpush.msra.mxu1 %v1014_v33  ;;  %v1122_v51 = vld [vmem:[%s1785_s2 + $0x118] sm:$0xff]  ;;  %1857 = vst [vmem:[#allocation14_spill] sm:$0xff] %v1127_v52  ;;  %v1139_v54 = vld [vmem:[%s1785_s2 + $0x110] sm:$0xff]  ;;  %v1144_v55 = vld [vmem:[%s1785_s2 + $0x1a8] sm:$0xff] }
  0x13   :  { %307 = vmatpush.msra.mxu3 %v1021_v34  ;;  %324 = vmatpush.msrb.mxu0 %v1026_v35  ;;  %v1134_v53 = vld [vmem:[%s1785_s2 + $0x18] sm:$0xff]  ;;  %1858 = vst [vmem:[#allocation15_spill] sm:$0xff] %v1144_v55 }
  0x14   :  { %288 = vmatpush.msra.mxu2 %v1032_v36  ;;  %267 = vmatpush.msra.mxu1 %v1038_v37 }
  0x15   :  { %308 = vmatpush.msra.mxu3 %v1045_v38  ;;  %325 = vmatpush.msrb.mxu0 %v1050_v39 }
  0x16   :  { %289 = vmatpush.msra.mxu2 %v1056_v40  ;;  %268 = vmatpush.msra.mxu1 %v1062_v41 }
  0x17   :  { %309 = vmatpush.msra.mxu3 %v1069_v42  ;;  %326 = vmatpush.msrb.mxu0 %v1074_v43 }
  0x18   :  { %290 = vmatpush.msra.mxu2 %v1080_v44  ;;  %269 = vmatpush.msra.mxu1 %v1086_v45 }
  0x19   :  { %310 = vmatpush.msra.mxu3 %v1093_v46  ;;  %327 = vmatpush.msrb.mxu0 %v1098_v47 }
  0x1a   :  { %291 = vmatpush.msra.mxu2 %v1104_v48  ;;  %270 = vmatpush.msra.mxu1 %v1110_v49 }
  0x1b   :  { %12 = vsyncpa [#allocation3], 0  ;;  %311 = vmatpush.msra.mxu3 %v1122_v51  ;;  %v1152_v56 = vld [vmem:[%s1785_s2 + $0x88] sm:$0xff]  ;;  %328 = vmatpush.msrb.mxu0 %v1127_v52  ;;  %v1158_v57 = vld [vmem:[%s1785_s2 + $0x10] sm:$0xff]  ;;  %vm50_vm1 = vcmask 80896   ;;  %vm642_vm3 = vcmask 1043456  }
  0x1c   :  { %292 = vmatpush.msra.mxu2 %v1117_v50  ;;  %271 = vmatpush.msra.mxu1 %v1134_v53  ;;  %v1165_v58 = vld [vmem:[%s1785_s2 + $0x108] sm:$0xff]  ;;  %v1170_v59 = vld [vmem:[%s1785_s2 + $0x1a0] sm:$0xff]  ;;  %v1189_v62 = vld [vmem:[%s1785_s2 + $0x2f8] sm:$0xff]  ;;  %vm638_vm5 = vcmask 31744   ;;  %vm625_vm10 = vcmask 25600   ;;  %vm683_vm12 = vcmask 74752  }
  0x1d   :  { %1859 = vst [vmem:[#allocation16_spill] sm:$0xff] %v1170_v59  ;;  %312 = vmatpush.msra.mxu3 %v1139_v54  ;;  %v1176_v60 = vld [vmem:[%s1785_s2 + $0x80] sm:$0xff]  ;;  %329 = vmatpush.msrb.mxu0 %v1144_v55  ;;  %v1182_v61 = vld [vmem:[%s1785_s2 + $0x8] sm:$0xff]  ;;  %v1201_v0 = vld [vmem:[%s1785_s2 + $0x378] sm:$0xff]  ;;  %s727_s21 = sshll.u32 %s1790_s7, 4  ;;  %s728_s21 = int_to_ptr.hbm [resolvable:$true] %s727_s21 }
  0x1e   :  { %293 = vmatpush.msra.mxu2 %v1152_v56  ;;  %272 = vmatpush.msra.mxu1 %v1158_v57  ;;  %v1194_v63 = vld [vmem:[%s1785_s2 + $0x100] sm:$0xff]  ;;  %v1213_v10 = vld [vmem:[%s1785_s2 + $0x2f0] sm:$0xff]  ;;  %v1218_v13 = vld [vmem:[%s1785_s2 + $0x198] sm:$0xff] }
  0x1f   :  { %313 = vmatpush.msra.mxu3 %v1165_v58  ;;  %330 = vmatpush.msrb.mxu0 %v1170_v59  ;;  %v1206_v3 = vld [vmem:[%s1785_s2] sm:$0xff]  ;;  %1860 = vst [vmem:[#allocation17_spill] sm:$0xff] %v1218_v13  ;;  %v1225_v59 = vld [vmem:[%s1785_s2 + $0x278] sm:$0xff]  ;;  %v1230_v55 = vld [vmem:[%s1785_s2 + $0x370] sm:$0xff] }
  0x20   :  { %294 = vmatpush.msra.mxu2 %v1176_v60  ;;  %273 = vmatpush.msra.mxu1 %v1182_v61  ;;  %1861 = vst [vmem:[#allocation18_spill] sm:$0xff] %v1230_v55  ;;  %v1237_v52 = vld [vmem:[%s1785_s2 + $0x2e8] sm:$0xff]  ;;  %v1242_v47 = vld [vmem:[%s1785_s2 + $0x190] sm:$0xff]  ;;  %v1261_v35 = vld [vmem:[%s1785_s2 + $0x2e0] sm:$0xff] }
  0x21   :  { %314 = vmatpush.msra.mxu3 %v1194_v63  ;;  %1862 = vst [vmem:[#allocation19_spill] sm:$0xff] %v1242_v47  ;;  %331 = vmatpush.msrb.mxu0 %v1218_v13  ;;  %v1249_v43 = vld [vmem:[%s1785_s2 + $0x270] sm:$0xff]  ;;  %v1254_v39 = vld [vmem:[%s1785_s2 + $0x368] sm:$0xff]  ;;  %v1282_v27 = vld [vmem:[%s1785_s2 + $0x2d8] sm:$0xff] }
  0x22   :  { %359 = vmatpush.msrb.mxu2 %v1189_v62  ;;  %274 = vmatpush.msra.mxu1 %v1206_v3  ;;  %1863 = vst [vmem:[#allocation20_spill] sm:$0xff] %v1249_v43  ;;  %v1266_v13 = vld [vmem:[%s1785_s2 + $0x188] sm:$0xff]  ;;  %v1301_v23 = vld [vmem:[%s1785_s2 + $0x260] sm:$0xff]  ;;  %v1306_v19 = vld [vmem:[%s1785_s2 + $0x2d0] sm:$0xff] }
  0x23   :  { %379 = vmatpush.msrb.mxu3 %v1201_v0  ;;  %1864 = vst [vmem:[#allocation21_spill] sm:$0xff] %v1254_v39  ;;  %332 = vmatpush.msrb.mxu0 %v1242_v47  ;;  %v1277_v31 = vld [vmem:[%s1785_s2 + $0x268] sm:$0xff]  ;;  %v1287_v47 = vld [vmem:[%s1785_s2 + $0x360] sm:$0xff]  ;;  %v1404_v17 = vld [vmem:[%s1785_s2 + $0x330] sm:$0xff] }
  0x24   :  { %360 = vmatpush.msrb.mxu2 %v1213_v10  ;;  %339 = vmatpush.msrb.mxu1 %v1225_v59  ;;  %1865 = vst [vmem:[#allocation22_spill] sm:$0xff] %v1261_v35 }
  0x25   :  { %380 = vmatpush.msrb.mxu3 %v1230_v55  ;;  %1866 = vst [vmem:[#allocation23_spill] sm:$0xff] %v1266_v13  ;;  %333 = vmatpush.msrb.mxu0 %v1266_v13  ;;  %v1294_v13 = vld [vmem:[%s1785_s2 + $0x180] sm:$0xff] }
  0x26   :  { %361 = vmatpush.msrb.mxu2 %v1237_v52  ;;  %340 = vmatpush.msrb.mxu1 %v1249_v43  ;;  %1867 = vst [vmem:[#allocation24_spill] sm:$0xff] %v1277_v31  ;;  %v1456_v43 = vld [vmem:[%s1785_s2 + $0x290] sm:$0xff]  ;;  %v1518_v55 = vld [vmem:[%s1785_s2 + $0x200] sm:$0xff] }
  0x27   :  { %381 = vmatpush.msrb.mxu3 %v1254_v39  ;;  %1868 = vst [vmem:[#allocation25_spill] sm:$0xff] %v1282_v27  ;;  %334 = vmatpush.msrb.mxu0 %v1294_v13  ;;  %v1451_v39 = vld [vmem:[%s1785_s2 + $0x220] sm:$0xff] }
  0x28   :  { %362 = vmatpush.msrb.mxu2 %v1261_v35  ;;  %1869 = vst [vmem:[#allocation26_spill] sm:$0xff] %v1287_v47  ;;  %341 = vmatpush.msrb.mxu1 %v1277_v31  ;;  %v1329_v31 = vld [vmem:[%s1785_s2 + $0x350] sm:$0xff] }
  0x29   :  { %1870 = vst [vmem:[#allocation27_spill] sm:$0xff] %v1294_v13  ;;  %382 = vmatpush.msrb.mxu3 %v1287_v47  ;;  %v1319_v13 = vld [vmem:[%s1785_s2 + $0x258] sm:$0xff]  ;;  %v1324_v47 = vld [vmem:[%s1785_s2 + $0x2c8] sm:$0xff] }
  0x2a   :  { %363 = vmatpush.msrb.mxu2 %v1282_v27  ;;  %1871 = vst [vmem:[#allocation28_spill] sm:$0xff] %v1301_v23  ;;  %v1311_v27 = vld [vmem:[%s1785_s2 + $0x358] sm:$0xff]  ;;  %342 = vmatpush.msrb.mxu1 %v1301_v23  ;;  %v1347_v23 = vld [vmem:[%s1785_s2 + $0x348] sm:$0xff] }
  0x2b   :  { %1872 = vst [vmem:[#allocation29_spill] sm:$0xff] %v1306_v19  ;;  %383 = vmatpush.msrb.mxu3 %v1311_v27 }
  0x2c   :  { %1873 = vst [vmem:[#allocation30_spill] sm:$0xff] %v1311_v27  ;;  %364 = vmatpush.msrb.mxu2 %v1306_v19  ;;  %343 = vmatpush.msrb.mxu1 %v1319_v13  ;;  %v1337_v27 = vld [vmem:[%s1785_s2 + $0x250] sm:$0xff]  ;;  %v1342_v19 = vld [vmem:[%s1785_s2 + $0x2c0] sm:$0xff] }
  0x2d   :  { %1874 = vst [vmem:[#allocation31_spill] sm:$0xff] %v1319_v13  ;;  %384 = vmatpush.msrb.mxu3 %v1329_v31  ;;  %v1365_v13 = vld [vmem:[%s1785_s2 + $0x340] sm:$0xff] }
  0x2e   :  { %1875 = vst [vmem:[#allocation32_spill] sm:$0xff] %v1324_v47  ;;  %365 = vmatpush.msrb.mxu2 %v1324_v47  ;;  %344 = vmatpush.msrb.mxu1 %v1337_v27  ;;  %v1360_v47 = vld [vmem:[%s1785_s2 + $0x2b8] sm:$0xff] }
  0x2f   :  { %1876 = vst [vmem:[#allocation33_spill] sm:$0xff] %v1329_v31  ;;  %385 = vmatpush.msrb.mxu3 %v1347_v23  ;;  %v1355_v31 = vld [vmem:[%s1785_s2 + $0x248] sm:$0xff] }
  0x30   :  { %1877 = vst [vmem:[#allocation34_spill] sm:$0xff] %v1337_v27  ;;  %366 = vmatpush.msrb.mxu2 %v1342_v19  ;;  %345 = vmatpush.msrb.mxu1 %v1355_v31  ;;  %v1381_v27 = vld [vmem:[%s1785_s2 + $0x2b0] sm:$0xff] }
  0x31   :  { %1878 = vst [vmem:[#allocation35_spill] sm:$0xff] %v1342_v19  ;;  %386 = vmatpush.msrb.mxu3 %v1365_v13  ;;  %v1376_v19 = vld [vmem:[%s1785_s2 + $0x240] sm:$0xff] }
  0x32   :  { %1879 = vst [vmem:[#allocation36_spill] sm:$0xff] %v1347_v23  ;;  %367 = vmatpush.msrb.mxu2 %v1360_v47  ;;  %v27_v23 = vld [vmem:[%s1783_s0] sm:$0xff]  ;;  %346 = vmatpush.msrb.mxu1 %v1376_v19 }
  0x33   :  { %1880 = vst [vmem:[#allocation37_spill] sm:$0xff] %v1355_v31  ;;  %v1399_v31 = vld [vmem:[%s1785_s2 + $0x2a8] sm:$0xff] }
  0x34   :  { %1881 = vst [vmem:[#allocation38_spill] sm:$0xff] %v1360_v47  ;;  %v1386_v47 = vld [vmem:[%s1785_s2 + $0x338] sm:$0xff]  ;;  %368 = vmatpush.msrb.mxu2 %v1381_v27 }
  0x35   :  { %1882 = vst [vmem:[#allocation39_spill] sm:$0xff] %v1365_v13  ;;  %387 = vmatpush.msrb.mxu3 %v1386_v47  ;;  %v1394_v13 = vld [vmem:[%s1785_s2 + $0x238] sm:$0xff] }
  0x36   :  { %1883 = vst [vmem:[#allocation40_spill] sm:$0xff] %v1376_v19  ;;  %347 = vmatpush.msrb.mxu1 %v1394_v13  ;;  %369 = vmatpush.msrb.mxu2 %v1399_v31  ;;  %v1422_v19 = vld [vmem:[%s1785_s2 + $0x328] sm:$0xff] }
  0x37   :  { %1884 = vst [vmem:[#allocation41_spill] sm:$0xff] %v1381_v27  ;;  %388 = vmatpush.msrb.mxu3 %v1404_v17  ;;  %v1417_v27 = vld [vmem:[%s1785_s2 + $0x2a0] sm:$0xff] }
  0x38   :  { %1885 = vst [vmem:[#allocation42_spill] sm:$0xff] %v1386_v47  ;;  %v1412_v47 = vld [vmem:[%s1785_s2 + $0x230] sm:$0xff]  ;;  %370 = vmatpush.msrb.mxu2 %v1417_v27 }
  0x39   :  { %240 = vst [vmem:[#allocation1] ss:$4 sm:$0xff] %v27_v23  ;;  %348 = vmatpush.msrb.mxu1 %v1412_v47  ;;  %389 = vmatpush.msrb.mxu3 %v1422_v19 }
  0x3a   :  { %1886 = vst [vmem:[#allocation43_spill] sm:$0xff] %v1394_v13  ;;  %v1440_v13 = vld [vmem:[%s1785_s2 + $0x320] sm:$0xff] }
  0x3b   :  { %1887 = vst [vmem:[#allocation44_spill] sm:$0xff] %v1399_v31  ;;  %v1435_v31 = vld [vmem:[%s1785_s2 + $0x298] sm:$0xff]  ;;  %390 = vmatpush.msrb.mxu3 %v1440_v13 }
  0x3c   :  { %1888 = vst [vmem:[#allocation45_spill] sm:$0xff] %v1404_v17  ;;  %v1430_v17 = vld [vmem:[%s1785_s2 + $0x228] sm:$0xff]  ;;  %371 = vmatpush.msrb.mxu2 %v1435_v31 }
  0x3d   :  { %1889 = vst [vmem:[#allocation46_spill] sm:$0xff] %v1412_v47  ;;  %349 = vmatpush.msrb.mxu1 %v1430_v17 }
  0x3e   :  { %1890 = vst [vmem:[#allocation47_spill] sm:$0xff] %v1417_v27  ;;  %372 = vmatpush.msrb.mxu2 %v1456_v43 }
  0x3f   :  { %1891 = vst [vmem:[#allocation48_spill] sm:$0xff] %v1422_v19  ;;  %v28_v19 = vld [vmem:[%s1783_s0 + $0x8] sm:$0xff]  ;;  %350 = vmatpush.msrb.mxu1 %v1451_v39 }
  0x40   :  { %1892 = vst [vmem:[#allocation49_spill] sm:$0xff] %v1430_v17  ;;  %v244_v47 = vld.sshfl [vmem:[#allocation1 + $0x8] sm:$0xff pattern:$0x73625140] }
  0x41   :  { %1893 = vst [vmem:[#allocation50_spill] sm:$0xff] %v1435_v31  ;;  %295 = vmatmul.f32.vlgmr.msra.gmra.mxu2 %v244_v47  ;;  %v245_v27 = vld.sshfl [vmem:[#allocation1 + $0x10] sm:$0xff pattern:$0x73625140]  ;;  %v1462_v47 = vld [vmem:[%s1785_s2 + $0x318] sm:$0xff] }
  0x42   :  { %1894 = vst [vmem:[#allocation51_spill] sm:$0xff] %v1440_v13  ;;  %315 = vmatmul.f32.vlgmr.msra.gmra.mxu3 %v245_v27  ;;  %v243_v13 = vld.sshfl [vmem:[#allocation1] sm:$0xff pattern:$0x73625140]  ;;  %v1469_v31 = vld [vmem:[%s1785_s2 + $0x218] sm:$0xff]  ;;  %v1474_v27 = vld [vmem:[%s1785_s2 + $0x288] sm:$0xff] }
  0x43   :  { %1895 = vst [vmem:[#allocation52_spill] sm:$0xff] %v1451_v39  ;;  %391 = vmatpush.msrb.mxu3 %v1462_v47  ;;  %275 = vmatmul.f32.vlgmr.msra.gmra.mxu1 %v243_v13  ;;  %v1479_v39 = vld [vmem:[%s1785_s2 + $0x310] sm:$0xff]  ;;  %v1496_v13 = vld [vmem:[%s1785_s2 + $0x308] sm:$0xff] }
  0x44   :  { %1896 = vst [vmem:[#allocation53_spill] sm:$0xff] %v1456_v43  ;;  %351 = vmatpush.msrb.mxu1 %v1469_v31  ;;  %373 = vmatpush.msrb.mxu2 %v1474_v27  ;;  %v1491_v43 = vld [vmem:[%s1785_s2 + $0x280] sm:$0xff] }
  0x45   :  { %1897 = vst [vmem:[#allocation54_spill] sm:$0xff] %v1462_v47  ;;  %v1486_v47 = vld [vmem:[%s1785_s2 + $0x210] sm:$0xff]  ;;  %392 = vmatpush.msrb.mxu3 %v1479_v39 }
  0x46   :  { %242 = vst [vmem:[#allocation1 + $0x20] ss:$4 sm:$0xff] %v28_v19  ;;  %352 = vmatpush.msrb.mxu1 %v1486_v47  ;;  %374 = vmatpush.msrb.mxu2 %v1491_v43 }
  0x47   :  { %1898 = vst [vmem:[#allocation55_spill] sm:$0xff] %v1469_v31  ;;  %v1509_v31 = vld [vmem:[%s1785_s2 + $0x300] sm:$0xff]  ;;  %393 = vmatpush.msrb.mxu3 %v1496_v13 }
  0x48   :  { %1899 = vst [vmem:[#allocation56_spill] sm:$0xff] %v1474_v27  ;;  %v1504_v27 = vld [vmem:[%s1785_s2 + $0x208] sm:$0xff]  ;;  %462 = vmatpush.msra.mxu2 %v838_v1  ;;  %v1904_v1 = vlaneseq }
  0x49   :  { %1900 = vst [vmem:[#allocation57_spill] sm:$0xff] %v1479_v39  ;;  %353 = vmatpush.msrb.mxu1 %v1504_v27  ;;  %394 = vmatpush.msrb.mxu3 %v1509_v31 }
  0x4a   :  { %1901 = vst [vmem:[#allocation58_spill] sm:$0xff] %v1486_v47  ;;  %v246_v47 = vld.sshfl [vmem:[#allocation1 + $0x18] sm:$0xff pattern:$0x73625140]  ;;  %463 = vmatpush.msra.mxu2 %v843_v2 }
  0x4b   :  { %1902 = vst [vmem:[#allocation59_spill] sm:$0xff] %v1491_v43  ;;  %v419_v43 = vmul.f32 %v27_v23, %v27_v23  ;;  %482 = vmatpush.msra.mxu3 %v849_v4  ;;  %354 = vmatpush.msrb.mxu1 %v1518_v55  ;;  %v1534_v2 = vld [vmem:[%s1785_s2 + $0x3f8] sm:$0xff]  ;;  %v788_v4 = vmov 0.0  }
  0x4c   :  { %1903 = vst [vmem:[#allocation60_spill] sm:$0xff] %v1496_v13  ;;  %v1522_v13 = vand.u32 127, %v1904_v1  ;;  %464 = vmatpush.msra.mxu2 %v860_v6 }
  0x4d   :  { %v248_v39 = vld.sshfl [vmem:[#allocation1 + $0x28] sm:$0xff pattern:$0x73625140]  ;;  %v249_v35 = vld.sshfl [vmem:[#allocation1 + $0x30] sm:$0xff pattern:$0x73625140]  ;;  %442 = vmatpush.msra.mxu1 %v854_v5  ;;  %483 = vmatpush.msra.mxu3 %v865_v7  ;;  %v420_v7 = vmul.f32 %v28_v19, %v28_v19 }
  0x4e   :  { %375 = vmatmul.f32.vlgmr.msrb.gmra.mxu2 %v248_v39  ;;  %423 = vst [vmem:[#allocation1] ss:$4 sm:$0xff] %v419_v43  ;;  %395 = vmatmul.f32.vlgmr.msrb.gmra.mxu3 %v249_v35  ;;  %v247_v17 = vld.sshfl [vmem:[#allocation1 + $0x20] sm:$0xff pattern:$0x73625140]  ;;  %v1545_v5 = vld [vmem:[%s1785_s2 + $0x3f0] sm:$0xff] }
  0x4f   :  { %355 = vmatmul.f32.vlgmr.msrb.gmra.mxu1 %v247_v17  ;;  %465 = vmatpush.msra.mxu2 %v886_v11  ;;  %v1564_v11 = vld [vmem:[%s1785_s2 + $0x3e0] sm:$0xff]  ;;  %v1608_v17 = vld [vmem:[%s1785_s2 + $0x3b8] sm:$0xff]  ;;  %v1626_v19 = vld [vmem:[%s1785_s2 + $0x3a8] sm:$0xff]  ;;  %vm711_vm14 = vcmp.eq.s32.totalorder %v1522_v13, 0  ;;  %vm713_vm15 = vcmp.eq.s32.totalorder %v1522_v13, 1 }
  0x50   :  { %443 = vmatpush.msra.mxu1 %v870_v8  ;;  %484 = vmatpush.msra.mxu3 %v877_v9  ;;  %v1550_v8 = vld.sshfl [vmem:[#allocation1 + $0x38] sm:$0xff pattern:$0x73625140]  ;;  %v1555_v9 = vld [vmem:[%s1785_s2 + $0x3e8] sm:$0xff]  ;;  %v1920_v43 = vld [vmem:[#allocation33_spill] sm:$0xff] }
  0x51   :  { %466 = vmatpush.msra.mxu2 %v908_v15  ;;  %425 = vst [vmem:[#allocation1 + $0x20] ss:$4 sm:$0xff] %v420_v7  ;;  %v1590_v15 = vld [vmem:[%s1785_s2 + $0x3c8] sm:$0xff]  ;;  %v1912_v35 = vld [vmem:[#allocation26_spill] sm:$0xff] }
  0x52   :  { %444 = vmatpush.msra.mxu1 %v892_v12  ;;  %485 = vmatpush.msra.mxu3 %v902_v14  ;;  %v1573_v12 = vld [vmem:[%s1785_s2 + $0x3d8] sm:$0xff]  ;;  %v1582_v14 = vld [vmem:[%s1785_s2 + $0x3d0] sm:$0xff] }
  0x53   :  { %467 = vmatpush.msra.mxu2 %v936_v20  ;;  %v1635_v20 = vld [vmem:[%s1785_s2 + $0x3a0] sm:$0xff]  ;;  %v1916_v39 = vld [vmem:[#allocation30_spill] sm:$0xff] }
  0x54   :  { %445 = vmatpush.msra.mxu1 %v913_v16  ;;  %486 = vmatpush.msra.mxu3 %v925_v18  ;;  %v1599_v16 = vld [vmem:[%s1785_s2 + $0x3c0] sm:$0xff]  ;;  %v1617_v18 = vld [vmem:[%s1785_s2 + $0x3b0] sm:$0xff]  ;;  %v1943_v7 = vld [vmem:[#allocation50_spill] sm:$0xff] }
  0x55   :  { %468 = vmatpush.msra.mxu2 %v960_v24  ;;  %v1662_v24 = vld [vmem:[%s1785_s2 + $0x388] sm:$0xff] }
  0x56   :  { %446 = vmatpush.msra.mxu1 %v942_v21  ;;  %487 = vmatpush.msra.mxu3 %v949_v22  ;;  %v1644_v21 = vld [vmem:[%s1785_s2 + $0x398] sm:$0xff]  ;;  %v1653_v22 = vld [vmem:[%s1785_s2 + $0x390] sm:$0xff] }
  0x57   :  { %469 = vmatpush.msra.mxu2 %v984_v28  ;;  %v1906_v28 = vld [vmem:[#allocation22_spill] sm:$0xff] }
  0x58   :  { %447 = vmatpush.msra.mxu1 %v966_v25  ;;  %488 = vmatpush.msra.mxu3 %v973_v26  ;;  %v1671_v25 = vld [vmem:[%s1785_s2 + $0x380] sm:$0xff]  ;;  %v1905_v26 = vld [vmem:[#allocation18_spill] sm:$0xff] }
  0x59   :  { %470 = vmatpush.msra.mxu2 %v1008_v32  ;;  %v1909_v32 = vld [vmem:[#allocation5_spill] sm:$0xff] }
  0x5a   :  { %448 = vmatpush.msra.mxu1 %v990_v29  ;;  %489 = vmatpush.msra.mxu3 %v997_v30  ;;  %v1907_v29 = vld [vmem:[#allocation20_spill] sm:$0xff]  ;;  %v1908_v30 = vld [vmem:[#allocation21_spill] sm:$0xff] }
  0x5b   :  { %471 = vmatpush.msra.mxu2 %v1032_v36  ;;  %v1913_v36 = vld [vmem:[#allocation6_spill] sm:$0xff] }
  0x5c   :  { %449 = vmatpush.msra.mxu1 %v1014_v33  ;;  %490 = vmatpush.msra.mxu3 %v1021_v34  ;;  %v1910_v33 = vld [vmem:[#allocation24_spill] sm:$0xff]  ;;  %v1911_v34 = vld [vmem:[#allocation25_spill] sm:$0xff] }
  0x5d   :  { %472 = vmatpush.msra.mxu2 %v1056_v40  ;;  %v1917_v40 = vld [vmem:[#allocation7_spill] sm:$0xff] }
  0x5e   :  { %450 = vmatpush.msra.mxu1 %v1038_v37  ;;  %491 = vmatpush.msra.mxu3 %v1045_v38  ;;  %v1914_v37 = vld [vmem:[#allocation28_spill] sm:$0xff]  ;;  %v1915_v38 = vld [vmem:[#allocation29_spill] sm:$0xff] }
  0x5f   :  { %473 = vmatpush.msra.mxu2 %v1080_v44  ;;  %v1921_v44 = vld [vmem:[#allocation8_spill] sm:$0xff] }
  0x60   :  { %451 = vmatpush.msra.mxu1 %v1062_v41  ;;  %492 = vmatpush.msra.mxu3 %v1069_v42  ;;  %v1918_v41 = vld [vmem:[#allocation31_spill] sm:$0xff]  ;;  %v1919_v42 = vld [vmem:[#allocation32_spill] sm:$0xff] }
  0x61   :  { %474 = vmatpush.msra.mxu2 %v1104_v48  ;;  %v1924_v48 = vld [vmem:[#allocation36_spill] sm:$0xff] }
  0x62   :  { %452 = vmatpush.msra.mxu1 %v1086_v45  ;;  %493 = vmatpush.msra.mxu3 %v1093_v46  ;;  %v1922_v45 = vld [vmem:[#allocation34_spill] sm:$0xff]  ;;  %v1923_v46 = vld [vmem:[#allocation35_spill] sm:$0xff] }
  0x63   :  { %475 = vmatpush.msra.mxu2 %v1117_v50  ;;  %v1926_v50 = vld [vmem:[#allocation37_spill] sm:$0xff] }
  0x64   :  { %453 = vmatpush.msra.mxu1 %v1110_v49  ;;  %494 = vmatpush.msra.mxu3 %v1122_v51  ;;  %v1925_v49 = vld [vmem:[#allocation9_spill] sm:$0xff]  ;;  %v1927_v51 = vld [vmem:[#allocation38_spill] sm:$0xff] }
  0x65   :  { %476 = vmatpush.msra.mxu2 %v1152_v56  ;;  %v1931_v56 = vld [vmem:[#allocation41_spill] sm:$0xff] }
  0x66   :  { %454 = vmatpush.msra.mxu1 %v1134_v53  ;;  %495 = vmatpush.msra.mxu3 %v1139_v54  ;;  %v1929_v53 = vld [vmem:[#allocation10_spill] sm:$0xff]  ;;  %v1930_v54 = vld [vmem:[#allocation40_spill] sm:$0xff] }
  0x67   :  { %477 = vmatpush.msra.mxu2 %v1176_v60  ;;  %v1935_v60 = vld [vmem:[#allocation44_spill] sm:$0xff] }
  0x68   :  { %455 = vmatpush.msra.mxu1 %v1158_v57  ;;  %496 = vmatpush.msra.mxu3 %v1165_v58  ;;  %v1932_v57 = vld [vmem:[#allocation42_spill] sm:$0xff]  ;;  %v1933_v58 = vld [vmem:[#allocation11_spill] sm:$0xff] }
  0x69   :  { %542 = vmatpush.msrb.mxu2 %v1189_v62  ;;  %v427_v62 = vld.sshfl [vmem:[#allocation1 + $0x8] sm:$0xff pattern:$0x73625140] }
  0x6a   :  { %456 = vmatpush.msra.mxu1 %v1182_v61  ;;  %497 = vmatpush.msra.mxu3 %v1194_v63  ;;  %v1936_v61 = vld [vmem:[#allocation45_spill] sm:$0xff]  ;;  %v1937_v63 = vld [vmem:[#allocation12_spill] sm:$0xff] }
  0x6b   :  { %543 = vmatpush.msrb.mxu2 %v1213_v10  ;;  %v1940_v10 = vld [vmem:[#allocation48_spill] sm:$0xff] }
  0x6c   :  { %562 = vmatpush.msrb.mxu3 %v1201_v0  ;;  %457 = vmatpush.msra.mxu1 %v1206_v3  ;;  %v1938_v0 = vld [vmem:[#allocation46_spill] sm:$0xff]  ;;  %v1939_v3 = vld [vmem:[#allocation47_spill] sm:$0xff] }
  0x6d   :  { %544 = vmatpush.msrb.mxu2 %v1237_v52  ;;  %v1928_v52 = vld [vmem:[#allocation39_spill] sm:$0xff] }
  0x6e   :  { %522 = vmatpush.msrb.mxu1 %v1225_v59  ;;  %563 = vmatpush.msrb.mxu3 %v1905_v26  ;;  %v1934_v59 = vld [vmem:[#allocation43_spill] sm:$0xff] }
  0x6f   :  { %545 = vmatpush.msrb.mxu2 %v1906_v28  ;;  %v1945_v26 = vld [vmem:[#allocation51_spill] sm:$0xff] }
  0x70   :  { %523 = vmatpush.msrb.mxu1 %v1907_v29  ;;  %564 = vmatpush.msrb.mxu3 %v1908_v30  ;;  %v426_v28 = vld.sshfl [vmem:[#allocation1] sm:$0xff pattern:$0x73625140]  ;;  %v1946_v29 = vld [vmem:[#allocation52_spill] sm:$0xff] }
  0x71   :  { %546 = vmatpush.msrb.mxu2 %v1911_v34  ;;  %v1947_v30 = vld [vmem:[#allocation15_spill] sm:$0xff]  ;;  %458 = vmatmul.f32.vlgmr.msra.gmra.mxu1 %v426_v28  ;;  %v1950_v34 = vld [vmem:[#allocation16_spill] sm:$0xff] }
  0x72   :  { %524 = vmatpush.msrb.mxu1 %v1910_v33  ;;  %565 = vmatpush.msrb.mxu3 %v1912_v35  ;;  %v1949_v33 = vld [vmem:[#allocation54_spill] sm:$0xff]  ;;  %v1951_v35 = vld [vmem:[#allocation55_spill] sm:$0xff] }
  0x73   :  { %547 = vmatpush.msrb.mxu2 %v1915_v38  ;;  %v431_v38 = vld.sshfl [vmem:[#allocation1 + $0x28] sm:$0xff pattern:$0x73625140] }
  0x74   :  { %v40_v23 = vpop.permute.xlu0 %39  ;;  %525 = vmatpush.msrb.mxu1 %v1914_v37  ;;  %566 = vmatpush.msrb.mxu3 %v1916_v39  ;;  %v1953_v37 = vld [vmem:[#allocation57_spill] sm:$0xff] }
  0x75   :  { %vm41_vm2 = vcmp.eq.s32.totalorder %v1522_v13, %v40_v23  ;;  %548 = vmatpush.msrb.mxu2 %v1919_v42  ;;  %v428_v23 = vld.sshfl [vmem:[#allocation1 + $0x10] sm:$0xff pattern:$0x73625140]  ;;  %v1957_v42 = vld [vmem:[#allocation60_spill] sm:$0xff] }
  0x76   :  { %v1538_v6 = vsel %vm41_vm2, 1.0, %v788_v4  ;;  %526 = vmatpush.msrb.mxu1 %v1918_v41  ;;  %567 = vmatpush.msrb.mxu3 %v1920_v43  ;;  %v1942_v4 = vld [vmem:[#allocation49_spill] sm:$0xff]  ;;  %v1956_v41 = vld [vmem:[#allocation59_spill] sm:$0xff] }
  0x77   :  { %738 = vmatmul.msk.f32.vlgmr.msra.gmra.mxu0 %vm50_vm1, %v1538_v6  ;;  %549 = vmatpush.msrb.mxu2 %v1923_v46  ;;  %v1954_v39 = vld [vmem:[#allocation17_spill] sm:$0xff]  ;;  %v1959_v46 = vld [vmem:[#allocation23_spill] sm:$0xff] }
  0x78   :  { %399 = vmatpush.msra.mxu0 %v1534_v2  ;;  %527 = vmatpush.msrb.mxu1 %v1922_v45  ;;  %v432_v43 = vld.sshfl [vmem:[#allocation1 + $0x30] sm:$0xff pattern:$0x73625140]  ;;  %v430_v45 = vld.sshfl [vmem:[#allocation1 + $0x20] sm:$0xff pattern:$0x73625140] }
  0x79   :  { %568 = vmatpush.msrb.mxu3 %v1924_v48  ;;  %550 = vmatpush.msrb.mxu2 %v1927_v51  ;;  %v429_v48 = vld.sshfl [vmem:[#allocation1 + $0x18] sm:$0xff pattern:$0x73625140] }
  0x7a   :  { %400 = vmatpush.msra.mxu0 %v1545_v5  ;;  %528 = vmatpush.msrb.mxu1 %v1926_v50 }
  0x7b   :  { %569 = vmatpush.msrb.mxu3 %v1928_v52  ;;  %551 = vmatpush.msrb.mxu2 %v1931_v56 }
  0x7c   :  { %401 = vmatpush.msra.mxu0 %v1555_v9  ;;  %529 = vmatpush.msrb.mxu1 %v1930_v54 }
  0x7d   :  { %570 = vmatpush.msrb.mxu3 %v1932_v57  ;;  %552 = vmatpush.msrb.mxu2 %v1935_v60 }
  0x7e   :  { %402 = vmatpush.msra.mxu0 %v1564_v11  ;;  %530 = vmatpush.msrb.mxu1 %v1934_v59 }
  0x7f   :  { %335 = vmatmul.f32.vlgmr.msrb.gmra.mxu0 %v246_v47  ;;  %571 = vmatpush.msrb.mxu3 %v1936_v61  ;;  %v1941_v47 = vld [vmem:[#allocation13_spill] sm:$0xff] }
  0x80   :  { %403 = vmatpush.msra.mxu0 %v1573_v12  ;;  %531 = vmatpush.msrb.mxu1 %v1938_v0 }
  0x81   :  { %553 = vmatpush.msrb.mxu2 %v1939_v3  ;;  %572 = vmatpush.msrb.mxu3 %v1940_v10 }
  0x82   :  { %404 = vmatpush.msra.mxu0 %v1582_v14  ;;  %478 = vmatmul.f32.vlgmr.msra.gmra.mxu2 %v427_v62 }
  0x83   :  { %532 = vmatpush.msrb.mxu1 %v1942_v4  ;;  %554 = vmatpush.msrb.mxu2 %v1943_v7 }
  0x84   :  { %405 = vmatpush.msra.mxu0 %v1590_v15  ;;  %573 = vmatpush.msrb.mxu3 %v1945_v26 }
  0x85   :  { %498 = vmatmul.f32.vlgmr.msra.gmra.mxu3 %v428_v23  ;;  %533 = vmatpush.msrb.mxu1 %v1946_v29 }
  0x86   :  { %406 = vmatpush.msra.mxu0 %v1599_v16  ;;  %574 = vmatpush.msrb.mxu3 %v1949_v33 }
  0x87   :  { %534 = vmatpush.msrb.mxu1 %v1951_v35 }
  0x88   :  { %407 = vmatpush.msra.mxu0 %v1608_v17  ;;  %575 = vmatpush.msrb.mxu3 %v1953_v37 }
  0x8a   :  { %408 = vmatpush.msra.mxu0 %v1617_v18  ;;  %576 = vmatpush.msrb.mxu3 %v1957_v42 }
  0x8c   :  { %409 = vmatpush.msra.mxu0 %v1626_v19  ;;  %577 = vmatpush.msrb.mxu3 %v1509_v31  ;;  %v433_v31 = vld.sshfl [vmem:[#allocation1 + $0x38] sm:$0xff pattern:$0x73625140] }
  0x8d   :  { %578 = vmatmul.f32.vlgmr.msrb.gmra.mxu3 %v432_v43 }
  0x8e   :  { %410 = vmatpush.msra.mxu0 %v1635_v20 }
  0x90   :  { %411 = vmatpush.msra.mxu0 %v1644_v21 }
  0x92   :  { %412 = vmatpush.msra.mxu0 %v1653_v22 }
  0x94   :  { %413 = vmatpush.msra.mxu0 %v1662_v24 }
  0x96   :  { %414 = vmatpush.msra.mxu0 %v1671_v25 }
  0x97   :  { %415 = vmatmul.f32.vlgmr.msra.gmra.mxu0 %v1550_v8  ;;  %v1944_v8 = vld [vmem:[#allocation14_spill] sm:$0xff] }
  0x98   :  { %502 = vmatpush.msrb.mxu0 %v1909_v32  ;;  %v1948_v32 = vld [vmem:[#allocation53_spill] sm:$0xff] }
  0x99   :  { %555 = vmatpush.msrb.mxu2 %v1948_v32 }
  0x9a   :  { %503 = vmatpush.msrb.mxu0 %v1913_v36  ;;  %v1952_v36 = vld [vmem:[#allocation56_spill] sm:$0xff] }
  0x9b   :  { %556 = vmatpush.msrb.mxu2 %v1952_v36 }
  0x9c   :  { %504 = vmatpush.msrb.mxu0 %v1917_v40  ;;  %v1955_v40 = vld [vmem:[#allocation58_spill] sm:$0xff] }
  0x9d   :  { %535 = vmatpush.msrb.mxu1 %v1955_v40  ;;  %557 = vmatpush.msrb.mxu2 %v1956_v41 }
  0x9e   :  { %505 = vmatpush.msrb.mxu0 %v1921_v44  ;;  %v1958_v44 = vld [vmem:[#allocation19_spill] sm:$0xff]  ;;  %558 = vmatmul.f32.vlgmr.msrb.gmra.mxu2 %v431_v38 }
  0x9f   :  { %536 = vmatpush.msrb.mxu1 %v1504_v27 }
  0xa0   :  { %506 = vmatpush.msrb.mxu0 %v1925_v49  ;;  %v1960_v49 = vld [vmem:[#allocation27_spill] sm:$0xff] }
  0xa1   :  { %537 = vmatpush.msrb.mxu1 %v1518_v55  ;;  %v747_v55 = vld [vmem:[%s1787_s4] ss:$0 sm:$0xff]  ;;  %s789_s4 = smov 124  }
  0xa2   :  { %507 = vmatpush.msrb.mxu0 %v1929_v53  ;;  %538 = vmatmul.f32.vlgmr.msrb.gmra.mxu1 %v430_v45 }
  0xa4   :  { %508 = vmatpush.msrb.mxu0 %v1933_v58 }
  0xa6   :  { %509 = vmatpush.msrb.mxu0 %v1937_v63 }
  0xa8   :  { %510 = vmatpush.msrb.mxu0 %v1941_v47 }
  0xaa   :  { %511 = vmatpush.msrb.mxu0 %v1944_v8 }
  0xac   :  { %512 = vmatpush.msrb.mxu0 %v1947_v30 }
  0xae   :  { %513 = vmatpush.msrb.mxu0 %v1950_v34 }
  0xb0   :  { %514 = vmatpush.msrb.mxu0 %v1954_v39 }
  0xb2   :  { %515 = vmatpush.msrb.mxu0 %v1958_v44 }
  0xb4   :  { %516 = vmatpush.msrb.mxu0 %v1959_v46 }
  0xb6   :  { %517 = vmatpush.msrb.mxu0 %v1960_v49 }
  0xb7   :  { %518 = vmatmul.f32.vlgmr.msrb.gmra.mxu0 %v429_v48 }
  0xb8   :  { %582 = vmatpush.msra.mxu0 %v1534_v2 }
  0xba   :  { %583 = vmatpush.msra.mxu0 %v1545_v5 }
  0xbc   :  { %584 = vmatpush.msra.mxu0 %v1555_v9  ;;  %v633_v9 = vld [vmem:[%s1788_s5] sm:$0xf]  ;;  %s790_s5 = smov 4  }
  0xbd   :  { %739 = vmatpush.msk.msra.mxu1 %vm642_vm3, %v633_v9 }
  0xbe   :  { %585 = vmatpush.msra.mxu0 %v1564_v11 }
  0xc0   :  { %586 = vmatpush.msra.mxu0 %v1573_v12 }
  0xc2   :  { %587 = vmatpush.msra.mxu0 %v1582_v14 }
  0xc4   :  { %588 = vmatpush.msra.mxu0 %v1590_v15  ;;  %v296_v12 = vpop.f32.mrf.mxu2  ;;  %v276_v15 = vpop.f32.mrf.mxu1 }
  0xc6   :  { %589 = vmatpush.msra.mxu0 %v1599_v16  ;;  %v297_v16 = vadd.f32 %v296_v12, %v276_v15 }
  0xc8   :  { %590 = vmatpush.msra.mxu0 %v1608_v17  ;;  %v316_v17 = vpop.f32.mrf.mxu3 }
  0xca   :  { %591 = vmatpush.msra.mxu0 %v1617_v18  ;;  %v317_v18 = vadd.f32 %v316_v17, %v297_v16 }
  0xcc   :  { %592 = vmatpush.msra.mxu0 %v1626_v19 }
  0xce   :  { %593 = vmatpush.msra.mxu0 %v1635_v20 }
  0xd0   :  { %594 = vmatpush.msra.mxu0 %v1644_v21 }
  0xd1   :  { %v376_v53 = vpop.f32.mrf.mxu2  ;;  %v396_v60 = vpop.f32.mrf.mxu3 }
  0xd2   :  { %595 = vmatpush.msra.mxu0 %v1653_v22 }
  0xd4   :  { %596 = vmatpush.msra.mxu0 %v1662_v24 }
  0xd6   :  { %597 = vmatpush.msra.mxu0 %v1671_v25  ;;  %v356_v25 = vpop.f32.mrf.mxu1 }
  0xd7   :  { %598 = vmatmul.f32.vlgmr.msra.gmra.mxu0 %v433_v31 }
  0xee   :  { %v459_v36 = vpop.f32.mrf.mxu1 }
  0xf4   :  { %v75_v27 = vpop.f32.mrf.mxu0 }
  0xf5   :  { %v1757_v2 = vadd.f32 %v747_v55, %v75_v27 }
  0xf7   :  { %v79_v5 = vand.u32 2147483647, %v1757_v2  ;;  %v78_v59 = vmax.f32 %v1757_v2, 0.0  ;;  %v603_v10 = vmul.f32 2.0, %v1757_v2  ;;  %v606_v49 = vmul.f32 256.0, %v1757_v2 }
  0xf9   :  { %v80_v11 = vsub.f32 0.0, %v79_v5  ;;  %v607_v5 = vmul.f32 %v606_v49, %v1757_v2 }
  0xfb   :  { %v81_v14 = vmul.f32 1.442695, %v80_v11 }
  0xfc   :  { %v336_v19 = vpop.f32.mrf.mxu0 }
  0xfd   :  { %749 = vpow2.f32 %v81_v14  ;;  %v337_v24 = vadd.f32 %v336_v19, %v317_v18 }
  0xff   :  { %v357_v51 = vadd.f32 %v356_v25, %v337_v24 }
 0x101   :  { %v377_v58 = vadd.f32 %v376_v53, %v357_v51 }
 0x103   :  { %v750_v20 = vpop.eup %749  ;;  %v397_v63 = vadd.f32 %v396_v60, %v377_v58 }
 0x104   :  { %v83_v21 = vadd.f32 1.0, %v750_v20  ;;  %v86_v22 = vmul.f32 -0.5, %v750_v20  ;;  %v89_v52 = vand.u32 2147483647, %v750_v20 }
 0x105   :  { %v479_v35 = vpop.f32.mrf.mxu2 }
 0x106   :  { %751 = vlog2.f32 %v83_v21  ;;  %v87_v50 = vadd.f32 1.0, %v86_v22  ;;  %vm90_vm4 = vcmp.lt.f32.partialorder %v89_v52, 0.0004427343  ;;  %v480_v37 = vadd.f32 %v479_v35, %v459_v36 }
 0x108   :  { %v88_v57 = vmul.f32 %v750_v20, %v87_v50  ;;  %v499_v38 = vpop.f32.mrf.mxu3  ;;  %v748_v20 = vld [vmem:[%s1789_s6] ss:$0 sm:$0xff]  ;;  %s791_s6 = smov [#allocation2]  }
 0x109   :  { %v500_v39 = vadd.f32 %v499_v38, %v480_v37  ;;  %s725_s18 = sshll.u32 %s791_s6, 4  ;;  %s726_s18 = int_to_ptr.vmem [resolvable:$true] %s725_s18 }
 0x10c   :  { %v752_v54 = vpop.eup %751 }
 0x10d   :  { %v85_v56 = vmul.f32 0.6931472, %v752_v54 }
 0x10f   :  { %v91_v61 = vsel %vm90_vm4, %v88_v57, %v85_v56 }
 0x110   :  { %v92_v62 = vadd.f32 %v91_v61, %v78_v59  ;;  %v579_v46 = vpop.f32.mrf.mxu3 }
 0x112   :  { %753 = vrcp.f32 %v92_v62  ;;  %v104_v26 = vand.u32 2147483648, %v92_v62  ;;  %v102_v29 = vand.u32 2147483647, %v92_v62  ;;  %vm98_vm7 = vweird.f32 %v92_v62 }
 0x113   :  { %755 = vlog2.f32 %v92_v62 }
 0x114   :  { %v416_v0 = vpop.f32.mrf.mxu0  ;;  %v105_v32 = vor.u32 1.1754944e-38, %v104_v26  ;;  %vm103_vm9 = vcmp.eq.f32.partialorder %v102_v29, 8.507059e+37 }
 0x115   :  { %v417_v3 = vadd.f32 %v416_v0, %v397_v63 }
 0x117   :  { %v602_v47 = vmul.f32 0.00390625, %v417_v3  ;;  %v604_v23 = vmul.f32 %v603_v10, %v417_v3 }
 0x118   :  { %v754_v4 = vpop.eup %753 }
 0x119   :  { %740 = vmatmul.msk.f32.vlgmr.msra.gmra.mxu1 %vm638_vm5, %v602_v47  ;;  %v94_v7 = vmul.f32 %v754_v4, %v92_v62  ;;  %vm99_vm6 = vweird.f32 %v754_v4  ;;  %v756_v14 = vpop.eup %755  ;;  %v32_v47 = vshrl.u32 %v1904_v1, 7 }
 0x11a   :  { %vm100_vm8 = vmor %vm98_vm7, %vm99_vm6  ;;  %v109_v15 = vmul.f32 0.6931472, %v756_v14 }
 0x11b   :  { %v95_v8 = vsub.f32 1.0, %v94_v7  ;;  %vm35_vm13 = vcmp.lt.s32.totalorder %v32_v47, 2  ;;  %vm717_vm1 = vcmp.eq.s32.totalorder %v32_v47, 0 }
 0x11c   :  { %v609_v16 = vadd.f32 1.837877, %v109_v15 }
 0x11d   :  { %v96_v28 = vmul.f32 %v754_v4, %v95_v8 }
 0x11e   :  { %v610_v17 = vmul.f32 256.0, %v609_v16 }
 0x11f   :  { %v97_v30 = vadd.f32 %v754_v4, %v96_v28  ;;  %v539_v42 = vpop.f32.mrf.mxu1 }
 0x121   :  { %v101_v33 = vsel %vm100_vm8, %v754_v4, %v97_v30  ;;  %v559_v44 = vpop.f32.mrf.mxu2 }
 0x122   :  { %v106_v34 = vsel %vm103_vm9, %v105_v32, %v101_v33 }
 0x123   :  { %612 = vrot.lane.b32.xlu0 %v106_v34, %s789_s4 }
 0x134   :  { %v519_v40 = vpop.f32.mrf.mxu0 }
 0x135   :  { %v520_v41 = vadd.f32 %v519_v40, %v500_v39 }
 0x137   :  { %v540_v43 = vadd.f32 %v539_v42, %v520_v41 }
 0x139   :  { %v560_v45 = vadd.f32 %v559_v44, %v540_v43 }
 0x13b   :  { %v580_v48 = vadd.f32 %v579_v46, %v560_v45 }
 0x154   :  { %v599_v31 = vpop.f32.mrf.mxu0 }
 0x155   :  { %v600_v55 = vadd.f32 %v599_v31, %v580_v48 }
 0x157   :  { %v605_v27 = vsub.f32 %v600_v55, %v604_v23 }
 0x159   :  { %v608_v9 = vadd.f32 %v607_v5, %v605_v27 }
 0x195   :  { %v613_v11 = vpop.permute.xlu0 %612 }
 0x196   :  { %v615_v12 = vmul.f32 %v613_v11, %v608_v9  ;;  %v663_v21 = vpop.f32.mrf.mxu1 }
 0x197   :  { %v664_v2 = vadd.f32 %v748_v20, %v663_v21 }
 0x198   :  { %617 = vrot.lane.b32.xlu1 %v615_v12, %s790_s5 }
 0x199   :  { %v669_v22 = vand.u32 2147483647, %v664_v2  ;;  %v666_v59 = vmax.f32 %v664_v2, 0.0  ;;  %v667_v60 = vmul.f32 %v1538_v6, %v664_v2 }
 0x19b   :  { %v670_v24 = vsub.f32 0.0, %v669_v22  ;;  %v668_v0 = vsub.f32 %v666_v59, %v667_v60 }
 0x19d   :  { %v671_v25 = vmul.f32 1.442695, %v670_v24 }
 0x19f   :  { %757 = vpow2.f32 %v671_v25 }
 0x1a5   :  { %v758_v50 = vpop.eup %757 }
 0x1a6   :  { %v673_v51 = vadd.f32 1.0, %v758_v50  ;;  %v676_v52 = vmul.f32 -0.5, %v758_v50  ;;  %v679_v56 = vand.u32 2147483647, %v758_v50 }
 0x1a8   :  { %759 = vlog2.f32 %v673_v51  ;;  %v677_v53 = vadd.f32 1.0, %v676_v52  ;;  %vm680_vm11 = vcmp.lt.f32.partialorder %v679_v56, 0.0004427343 }
 0x1aa   :  { %v678_v58 = vmul.f32 %v758_v50, %v677_v53 }
 0x1ae   :  { %v760_v54 = vpop.eup %759 }
 0x1af   :  { %v675_v57 = vmul.f32 0.6931472, %v760_v54 }
 0x1b1   :  { %v681_v63 = vsel %vm680_vm11, %v678_v58, %v675_v57 }
 0x1b2   :  { %v682_v3 = vadd.f32 %v681_v63, %v668_v0 }
 0x1b4   :  { %v684_v10 = vsel %vm683_vm12, %v682_v3, 0.0 }
 0x20a   :  { %v618_v18 = vpop.permute.xlu1 %617 }
 0x20b   :  { %v620_v19 = vadd.f32 %v618_v18, %v610_v17 }
 0x20d   :  { %622 = vrot.lane.b32.xlu1 %v620_v19, %s789_s4 }
 0x27f   :  { %v623_v61 = vpop.permute.xlu1 %622 }
 0x280   :  { %v626_v62 = vsel %vm625_vm10, %v623_v61, 0.0 }
 0x281   :  { %627 = vadd.xlane.f32.xlu2 %v626_v62 }
 0x289   :  { %685 = vadd.xlane.f32.xlu2 %v684_v10 }
 0x2f4   :  { %v628_v23 = vpop.xlane.xlu2 %627 }
 0x2f5   :  { %v629_v4 = vmul.f32 0.5, %v628_v23 }
 0x2f7   :  { %v630_v7 = vmul.f32 0.0009765625, %v629_v4  ;;  %v695_v8 = vsel %vm35_vm13, %v629_v4, 0.0 }
 0x2f8   :  { %v696_v26 = vsel %vm54_vm0, %v695_v8, 0.0 }
 0x2f9   :  { %v631_v6 = vadd.f32 5.5451775, %v630_v7  ;;  %v697_v28 = vrot.slane %v696_v26, 4 }
 0x2fb   :  { %v632_v29 = vmul.f32 1.442695, %v631_v6  ;;  %v698_v30 = vadd.f32 %v697_v28, %v696_v26 }
 0x2fc   :  { %v686_v32 = vpop.xlane.xlu2 %685 }
 0x2fd   :  { %v687_v33 = vsel %vm35_vm13, %v632_v29, 0.0  ;;  %v703_v34 = vsel %vm35_vm13, %v686_v32, 0.0  ;;  %v699_v36 = vrot.slane %v698_v30, 2 }
 0x2fe   :  { %v688_v35 = vsel %vm54_vm0, %v687_v33, 0.0  ;;  %v704_v37 = vsel %vm54_vm0, %v703_v34, 0.0  ;;  %vm715_vm0 = vcmp.eq.s32.totalorder %v1522_v13, 3 }
 0x2ff   :  { %v689_v1 = vrot.slane %v688_v35, 4  ;;  %v705_v38 = vrot.slane %v704_v37, 4  ;;  %v700_v41 = vadd.f32 %v699_v36, %v698_v30 }
 0x301   :  { %v690_v39 = vadd.f32 %v689_v1, %v688_v35  ;;  %v706_v40 = vadd.f32 %v705_v38, %v704_v37  ;;  %v701_v46 = vrot.slane %v700_v41, 1 }
 0x303   :  { %v691_v42 = vrot.slane %v690_v39, 2  ;;  %v707_v43 = vrot.slane %v706_v40, 2  ;;  %v702_v55 = vadd.f32 %v701_v46, %v700_v41 }
 0x305   :  { %v692_v44 = vadd.f32 %v691_v42, %v690_v39  ;;  %v708_v45 = vadd.f32 %v707_v43, %v706_v40 }
 0x307   :  { %v693_v48 = vrot.slane %v692_v44, 1  ;;  %v709_v49 = vrot.slane %v708_v45, 1 }
 0x309   :  { %v694_v31 = vadd.f32 %v693_v48, %v692_v44  ;;  %v710_v27 = vadd.f32 %v709_v49, %v708_v45 }
 0x30b   :  { %v712_v5 = vsel %vm711_vm14, %v694_v31, 0.0 }
 0x30c   :  { %v714_v9 = vsel %vm713_vm15, %v702_v55, %v712_v5 }
 0x30d   :  { %v716_v11 = vsel %vm715_vm0, %v710_v27, %v714_v9 }
 0x30e   :  { %v718_v12 = vsel %vm717_vm1, %v716_v11, 0.0 }
 0x30f   :  { %719 = vst [vmem:[#allocation2] sm:$0xff] %v718_v12 }
 0x310   :  { %730 = dma.vmem_to_hbm [thread:$0]  %s726_s18, 128, %s728_s21, [#allocation3]  }
 0x311   :  { %785 = dma.done.wait [#allocation3], 128  }
 0x312   :  { %786 = vsyncadd [#allocation3], 4294967168 }
 0x313   :  { %735 = vsyncpa [#allocation3], 1 }

</bundles_post_ra>
